<compile_context>
chip_gen: v5e
topology: v5e:2x2
jax: 0.10.0
libtpu: 0.0.40
codegen_flags: <defaults>
</compile_context>

<pallas_src>
import functools

import jax
import jax.numpy as jnp
from jax.experimental import pallas as pl
from jax.experimental.pallas import tpu as pltpu

_LN_EPS = 1e-5


# ---------------------------------------------------------------------------
# Kernel
# ---------------------------------------------------------------------------
def _smt_kernel(s_ref, w1_ref, w2_ref, w3_ref, vec_ref, o_ref, *, c_real):
    """One row-tile of the fused transition.

    s_ref   : (rt, c_pad)    f32/bf16 input tile
    wN_ref  : (c_pad, c_pad) bf16     weight (stored [c_in, c_out])
    vec_ref : (8, c_pad)     f32      rows: b1, b2, b3, gamma, beta, 0, 0, 0
    o_ref   : (rt, c_pad)    f32/bf16 output tile
    """
    c_pad = s_ref.shape[-1]
    inv_c = 1.0 / float(c_real)

    x_in = s_ref[...]
    s0 = x_in.astype(jnp.float32)          # residual / LayerNorm in f32

    b1 = vec_ref[0:1, :]
    b2 = vec_ref[1:2, :]
    b3 = vec_ref[2:3, :]
    gamma = vec_ref[3:4, :]
    beta = vec_ref[4:5, :]

    # linear_1 + ReLU   (bf16 operands, f32 accumulation on the MXU)
    h = jnp.dot(x_in.astype(jnp.bfloat16), w1_ref[...],
                preferred_element_type=jnp.float32)
    h = jnp.maximum(h + b1, 0.0)

    # linear_2 + ReLU
    h = jnp.dot(h.astype(jnp.bfloat16), w2_ref[...],
                preferred_element_type=jnp.float32)
    h = jnp.maximum(h + b2, 0.0)

    # linear_3 ('final' init -> zeros in the real module, computed generally)
    h = jnp.dot(h.astype(jnp.bfloat16), w3_ref[...],
                preferred_element_type=jnp.float32)

    # residual
    s = h + b3 + s0

    # LayerNorm over the TRUE channel count, two-pass variance.  Padded lanes
    # of the input/weights are zero; after subtracting the mean they would be
    # -mean, so mask them before the squared sum when c_pad != c.
    mean = jnp.sum(s, axis=-1, keepdims=True) * inv_c
    diff = s - mean
    if c_pad != c_real:
        lane = jax.lax.broadcasted_iota(jnp.int32, (1, c_pad), 1)
        diff = jnp.where(lane < c_real, diff, 0.0)
    var = jnp.sum(diff * diff, axis=-1, keepdims=True) * inv_c
    normed = diff * jax.lax.rsqrt(var + _LN_EPS)
    out = normed * gamma + beta            # padded lanes: gamma=beta=0 -> 0

    o_ref[...] = out.astype(o_ref.dtype)


# ---------------------------------------------------------------------------
# Helpers
# ---------------------------------------------------------------------------
def _round_up(x, m):
    return ((x + m - 1) // m) * m


def _cdiv(a, b):
    return -(-a // b)


def _vmem_capacity_bytes():
    try:
        info = pltpu.get_tpu_info()
        cap = getattr(info, "vmem_capacity_bytes", None)
        if cap:
            return int(cap)
    except Exception:
        pass
    return 64 * 1024 * 1024  # conservative: v7x per-TensorCore VMEM


def prepare_params(params, c=None):
    """One-time parameter prep (hoist out of the hot path): zero-pad weights
    to (c_pad, c_pad) and cast to bf16 for the MXU; pack b1/b2/b3/gamma/beta
    into a single (8, c_pad) f32 block (one DMA instead of five)."""
    if isinstance(params, dict) and params.get("_prepared", False):
        return params
    if c is None:
        c = params["w1"].shape[0]
    c_pad = max(128, _round_up(c, 128))

    def pad_w(w):
        w = jnp.asarray(w, jnp.float32)
        return jnp.pad(w, ((0, c_pad - c), (0, c_pad - c))).astype(jnp.bfloat16)

    def pad_v(v):
        v = jnp.asarray(v, jnp.float32).reshape(-1)
        return jnp.pad(v, (0, c_pad - c))

    zero = jnp.zeros((c_pad,), jnp.float32)
    vec = jnp.stack(
        [pad_v(params["b1"]), pad_v(params["b2"]), pad_v(params["b3"]),
         pad_v(params["gamma"]), pad_v(params["beta"]), zero, zero, zero],
        axis=0)                                             # (8, c_pad)
    return {"_prepared": True, "c": c, "c_pad": c_pad,
            "w1": pad_w(params["w1"]), "w2": pad_w(params["w2"]),
            "w3": pad_w(params["w3"]), "vec": vec}


def _choose_row_tile(rows, rt_cap):
    """Pick (rt, rows_pad).  Prefer an rt that divides rows exactly (no
    wrapper pad/slice HBM passes) with >=2 (ideally an even number of) grid
    steps (both v7x TensorCores); otherwise balanced minimal padding."""
    if rows % 8 == 0 and rows > 8:
        top = min(rt_cap, rows)
        floor = max(8, min(256, rt_cap // 4))
        for ok in (lambda g: g >= 2 and g % 2 == 0,   # even number of tiles
                   lambda g: g >= 2,                  # at least 2 tiles
                   lambda g: True):                   # single tile
            for rt in range(top, floor - 1, -8):
                if rows % rt == 0 and ok(rows // rt):
                    return rt, rows
    # Balanced padded fallback: (near-)maximal tile, minimal padding.
    grid = _cdiv(rows, rt_cap)
    rt = _round_up(_cdiv(rows, grid), 8)
    return rt, grid * rt


# ---------------------------------------------------------------------------
# Wrapper
# ---------------------------------------------------------------------------
def structure_module_transition(s, params, *, row_tile=None):
    """Fused StructureModuleTransition forward.

    s: [..., c] float32 or bfloat16.
    params: raw dict (w1/w2/w3 stored [c_in, c_out]; b1/b2/b3/gamma/beta of
    shape [c]) or the output of prepare_params() (preferred in hot loops)."""
    params = prepare_params(params)
    c, c_pad = params["c"], params["c_pad"]
    assert s.shape[-1] == c, (s.shape, c)

    lead = s.shape[:-1]
    rows = 1
    for d in lead:
        rows *= d
    s2d = s.reshape(rows, c)
    itemsize = jnp.dtype(s.dtype).itemsize

    # --- generation-aware VMEM budgeting ------------------------------------
    vmem_cap = _vmem_capacity_bytes()              # 128 MiB v5e/v6e, 64 MiB v7x
    vmem_limit = min(vmem_cap - (8 << 20), 96 << 20)
    budget = int(vmem_limit * 0.6)                 # headroom for Mosaic internals

    if row_tile is None:
        row_tile = 2048 if vmem_cap >= (100 << 20) else 1024

    def vmem_est(rt_):
        io = 2 * 2 * rt_ * c_pad * itemsize        # in + out, double-buffered
        tmp = 6 * rt_ * c_pad * 4                  # in-body f32/bf16 temporaries
        wts = 2 * (3 * c_pad * c_pad * 2 + 8 * c_pad * 4)  # worst case: dbl-buffered
        return io + tmp + wts

    rt_cap = max(8, _round_up(min(row_tile, _round_up(rows, 8)), 8))
    while rt_cap > 8 and vmem_est(rt_cap) > budget:
        rt_cap = max(8, _round_up(rt_cap // 2, 8))

    rt, rows_pad = _choose_row_tile(rows, rt_cap)
    grid = rows_pad // rt

    if rows_pad != rows or c_pad != c:
        s2d = jnp.pad(s2d, ((0, rows_pad - rows), (0, c_pad - c)))

    kernel = functools.partial(_smt_kernel, c_real=c)

    cost = pl.CostEstimate(
        flops=6 * rows_pad * c_pad * c_pad,
        bytes_accessed=(2 * rows_pad * c_pad * itemsize
                        + 3 * c_pad * c_pad * 2 + 8 * c_pad * 4),
        transcendentals=rows_pad,
    )

    def call(single_buffer_consts):
        kw = {}
        if single_buffer_consts and hasattr(pl, "Buffered"):
            kw = {"pipeline_mode": pl.Buffered(1)}   # constant blocks: 1 buffer
        w_spec = pl.BlockSpec((c_pad, c_pad), lambda i: (0, 0), **kw)
        v_spec = pl.BlockSpec((8, c_pad), lambda i: (0, 0), **kw)
        return pl.pallas_call(
            kernel,
            out_shape=jax.ShapeDtypeStruct((rows_pad, c_pad), s.dtype),
            grid_spec=pltpu.PrefetchScalarGridSpec(
                num_scalar_prefetch=0,
                grid=(grid,),
                in_specs=[
                    pl.BlockSpec((rt, c_pad), lambda i: (i, 0)),   # s tile
                    w_spec, w_spec, w_spec,                        # bf16 weights
                    v_spec,                                        # packed vectors
                ],
                out_specs=pl.BlockSpec((rt, c_pad), lambda i: (i, 0)),
            ),
            compiler_params=pltpu.CompilerParams(
                dimension_semantics=("parallel",),
                vmem_limit_bytes=int(vmem_limit),
            ),
            cost_estimate=cost,
        )(s2d, params["w1"], params["w2"], params["w3"], params["vec"])

    try:
        out = call(True)
    except Exception:
        # This JAX may not accept pipeline_mode=Buffered(1) on BlockSpec;
        # retry with default (double) buffering — identical semantics.
        out = call(False)

    if rows_pad != rows or c_pad != c:
        out = out[:rows, :c]
    return out.reshape(*lead, c)


# ---------------------------------------------------------------------------
# Parameter init (mirrors the PyTorch module's scheme) + pure-JAX reference
# ---------------------------------------------------------------------------
def init_params(key, c):
    """linear_1/linear_2: He ('relu') truncated-normal init, zero bias;
    linear_3: 'final' init (weights and bias zero); LayerNorm: gamma=1, beta=0.
    Weights are stored as [c_in, c_out]."""
    k1, k2 = jax.random.split(key)
    std = (2.0 / c) ** 0.5
    w1 = jax.random.truncated_normal(k1, -2.0, 2.0, (c, c), jnp.float32) * std
    w2 = jax.random.truncated_normal(k2, -2.0, 2.0, (c, c), jnp.float32) * std
    zeros = jnp.zeros((c,), jnp.float32)
    return {
        "w1": w1, "b1": zeros,
        "w2": w2, "b2": zeros,
        "w3": jnp.zeros((c, c), jnp.float32), "b3": zeros,
        "gamma": jnp.ones((c,), jnp.float32),
        "beta": zeros,
    }


def _reference(s, params, *, bf16_matmul=False):
    """Pure-JAX reference.  bf16_matmul=True mimics the kernel's MXU precision
    (bf16 operands, f32 accumulation) so correctness can be checked tightly."""
    c = s.shape[-1]
    x = s.reshape(-1, c)

    def mm(a, w):
        if bf16_matmul:
            return jnp.dot(a.astype(jnp.bfloat16), w.astype(jnp.bfloat16),
                           preferred_element_type=jnp.float32)
        return jnp.dot(a, w)

    s0 = x
    h = jnp.maximum(mm(s0, params["w1"]) + params["b1"], 0.0)
    h = jnp.maximum(mm(h, params["w2"]) + params["b2"], 0.0)
    h = mm(h, params["w3"]) + params["b3"]
    y = h + s0
    mean = jnp.mean(y, axis=-1, keepdims=True)
    var = jnp.mean((y - mean) ** 2, axis=-1, keepdims=True)
    y = (y - mean) * jax.lax.rsqrt(var + _LN_EPS)
    y = y * params["gamma"] + params["beta"]
    return y.reshape(s.shape)


# ---------------------------------------------------------------------------
# Self-test
# ---------------------------------------------------------------------------
if __name__ == "__main__":
    key = jax.random.PRNGKey(0)
    ks = jax.random.split(key, 8)

    # 1) Faithful module init (linear_3 'final' -> zeros): output reduces to
    #    LayerNorm(s), f32 end-to-end -> tight tolerance vs. f32 reference.
    batch, seq, c = 2, 8, 32
    s = jax.random.normal(ks[0], (batch, seq, c), jnp.float32)
    params = init_params(ks[1], c)
    out = jax.block_until_ready(structure_module_transition(s, params))
    ref = _reference(s, params)
    assert out.shape == (batch, seq, c)
    assert jnp.allclose(out, ref, atol=1e-4, rtol=1e-4), \
        float(jnp.max(jnp.abs(out - ref)))

    # 2) Full matmul path (random w3 / gamma / beta) with parameters prepared
    #    ONCE outside the call (hoisted padding/cast). bf16-matmul reference.
    std = (2.0 / c) ** 0.5
    params2 = dict(params)
    params2["w3"] = (
        jax.random.truncated_normal(ks[2], -2.0, 2.0, (c, c), jnp.float32) * std)
    params2["gamma"] = 1.0 + 0.1 * jax.random.normal(ks[3], (c,), jnp.float32)
    params2["beta"] = 0.1 * jax.random.normal(ks[4], (c,), jnp.float32)
    prepped2 = prepare_params(params2)
    out2 = jax.block_until_ready(structure_module_transition(s, prepped2))
    ref2 = _reference(s, params2, bf16_matmul=True)
    assert jnp.allclose(out2, ref2, atol=2e-3, rtol=2e-3), \
        float(jnp.max(jnp.abs(out2 - ref2)))

    # 3) Non-divisible rows/channels exercise the padded fallback path.
    b3_, s3_, c3_ = 3, 17, 48
    s3 = jax.random.normal(ks[5], (b3_, s3_, c3_), jnp.float32)
    params3 = init_params(ks[6], c3_)
    params3["w3"] = (
        jax.random.truncated_normal(ks[2], -2.0, 2.0, (c3_, c3_), jnp.float32)
        * (2.0 / c3_) ** 0.5)
    out3 = jax.block_until_ready(structure_module_transition(s3, params3))
    ref3 = _reference(s3, params3, bf16_matmul=True)
    assert out3.shape == (b3_, s3_, c3_)
    assert jnp.allclose(out3, ref3, atol=2e-3, rtol=2e-3), \
        float(jnp.max(jnp.abs(out3 - ref3)))

    # 4) bf16 activations (halved activation DMA), lane-dense c, no padding.
    c4 = 128
    s4 = jax.random.normal(ks[7], (2, 64, c4), jnp.float32)
    params4 = init_params(ks[1], c4)
    params4["w3"] = (
        jax.random.truncated_normal(ks[2], -2.0, 2.0, (c4, c4), jnp.float32)
        * (2.0 / c4) ** 0.5)
    s4_bf16 = s4.astype(jnp.bfloat16)
    out4 = jax.block_until_ready(structure_module_transition(s4_bf16, params4))
    assert out4.dtype == jnp.bfloat16 and out4.shape == (2, 64, c4)
    ref4 = _reference(s4_bf16.astype(jnp.float32), params4, bf16_matmul=True)
    assert jnp.allclose(out4.astype(jnp.float32), ref4, atol=5e-2, rtol=5e-2), \
        float(jnp.max(jnp.abs(out4.astype(jnp.float32) - ref4)))

    print("KERNEL_OK")
</pallas_src>

<mosaic_0001>
module attributes {stable_mosaic.version = 11 : i64} {
  func.func @_smt_kernel(%arg0: i32, %arg1: memref<8x128xf32, #tpu.memory_space<vmem>>, %arg2: memref<128x128xbf16, #tpu.memory_space<vmem>>, %arg3: memref<128x128xbf16, #tpu.memory_space<vmem>>, %arg4: memref<128x128xbf16, #tpu.memory_space<vmem>>, %arg5: memref<8x128xf32, #tpu.memory_space<vmem>>, %arg6: memref<8x128xf32, #tpu.memory_space<vmem>>) attributes {dimension_semantics = [#tpu.dimension_semantics<parallel>], iteration_bounds = array<i64: 2>, scalar_prefetch = 0 : i64, scratch_operands = 0 : i64, tpu.core_type = #tpu.core_type<tc>, window_params = [{transform_indices = @transform_0, window_bounds = array<i64: 8, 128>}, {pipeline_mode = #tpu.pipeline_mode<synchronous>, transform_indices = @transform_1, window_bounds = array<i64: 128, 128>}, {pipeline_mode = #tpu.pipeline_mode<synchronous>, transform_indices = @transform_2, window_bounds = array<i64: 128, 128>}, {pipeline_mode = #tpu.pipeline_mode<synchronous>, transform_indices = @transform_3, window_bounds = array<i64: 128, 128>}, {pipeline_mode = #tpu.pipeline_mode<synchronous>, transform_indices = @transform_4, window_bounds = array<i64: 8, 128>}, {transform_indices = @transform_5, window_bounds = array<i64: 8, 128>}]} {
    %c0 = arith.constant 0 : index
    %c0_0 = arith.constant 0 : index
    %0 = vector.load %arg1[%c0, %c0_0] : memref<8x128xf32, #tpu.memory_space<vmem>>, vector<8x128xf32>
    %c0_1 = arith.constant 0 : index
    %c0_2 = arith.constant 0 : index
    %1 = vector.load %arg5[%c0_1, %c0_2] : memref<8x128xf32, #tpu.memory_space<vmem>>, vector<1x128xf32>
    %c1 = arith.constant 1 : index
    %c0_3 = arith.constant 0 : index
    %2 = vector.load %arg5[%c1, %c0_3] : memref<8x128xf32, #tpu.memory_space<vmem>>, vector<1x128xf32>
    %c2 = arith.constant 2 : index
    %c0_4 = arith.constant 0 : index
    %3 = vector.load %arg5[%c2, %c0_4] : memref<8x128xf32, #tpu.memory_space<vmem>>, vector<1x128xf32>
    %c3 = arith.constant 3 : index
    %c0_5 = arith.constant 0 : index
    %4 = vector.load %arg5[%c3, %c0_5] : memref<8x128xf32, #tpu.memory_space<vmem>>, vector<1x128xf32>
    %c4 = arith.constant 4 : index
    %c0_6 = arith.constant 0 : index
    %5 = vector.load %arg5[%c4, %c0_6] : memref<8x128xf32, #tpu.memory_space<vmem>>, vector<1x128xf32>
    %6 = arith.truncf %0 : vector<8x128xf32> to vector<8x128xbf16>
    %c0_7 = arith.constant 0 : index
    %c0_8 = arith.constant 0 : index
    %7 = vector.load %arg2[%c0_7, %c0_8] : memref<128x128xbf16, #tpu.memory_space<vmem>>, vector<128x128xbf16>
    %cst = arith.constant dense<0.000000e+00> : vector<8x128xf32>
    %8 = tpu.matmul %6, %7, %cst {dimension_numbers = #tpu.dot_dimension_numbers<[1], [0], [0], [1], [0, 0, 1, 1], [], []>} : vector<8x128xbf16>, vector<128x128xbf16>, vector<8x128xf32> -> vector<8x128xf32>
    %9 = vector.broadcast %1 : vector<1x128xf32> to vector<8x128xf32>
    %10 = arith.addf %8, %9 : vector<8x128xf32>
    %cst_9 = arith.constant 0.000000e+00 : f32
    %11 = vector.broadcast %cst_9 : f32 to vector<8x128xf32>
    %12 = arith.maximumf %10, %11 : vector<8x128xf32>
    %13 = arith.truncf %12 : vector<8x128xf32> to vector<8x128xbf16>
    %c0_10 = arith.constant 0 : index
    %c0_11 = arith.constant 0 : index
    %14 = vector.load %arg3[%c0_10, %c0_11] : memref<128x128xbf16, #tpu.memory_space<vmem>>, vector<128x128xbf16>
    %cst_12 = arith.constant dense<0.000000e+00> : vector<8x128xf32>
    %15 = tpu.matmul %13, %14, %cst_12 {dimension_numbers = #tpu.dot_dimension_numbers<[1], [0], [0], [1], [0, 0, 1, 1], [], []>} : vector<8x128xbf16>, vector<128x128xbf16>, vector<8x128xf32> -> vector<8x128xf32>
    %16 = vector.broadcast %2 : vector<1x128xf32> to vector<8x128xf32>
    %17 = arith.addf %15, %16 : vector<8x128xf32>
    %cst_13 = arith.constant 0.000000e+00 : f32
    %18 = vector.broadcast %cst_13 : f32 to vector<8x128xf32>
    %19 = arith.maximumf %17, %18 : vector<8x128xf32>
    %20 = arith.truncf %19 : vector<8x128xf32> to vector<8x128xbf16>
    %c0_14 = arith.constant 0 : index
    %c0_15 = arith.constant 0 : index
    %21 = vector.load %arg4[%c0_14, %c0_15] : memref<128x128xbf16, #tpu.memory_space<vmem>>, vector<128x128xbf16>
    %cst_16 = arith.constant dense<0.000000e+00> : vector<8x128xf32>
    %22 = tpu.matmul %20, %21, %cst_16 {dimension_numbers = #tpu.dot_dimension_numbers<[1], [0], [0], [1], [0, 0, 1, 1], [], []>} : vector<8x128xbf16>, vector<128x128xbf16>, vector<8x128xf32> -> vector<8x128xf32>
    %23 = vector.broadcast %3 : vector<1x128xf32> to vector<8x128xf32>
    %24 = arith.addf %22, %23 : vector<8x128xf32>
    %25 = arith.addf %24, %0 : vector<8x128xf32>
    %cst_17 = arith.constant dense<0.000000e+00> : vector<8xf32>
    %26 = vector.multi_reduction <add>, %25, %cst_17 [1] : vector<8x128xf32> to vector<8xf32>
    %27 = vector.shape_cast %26 : vector<8xf32> to vector<8x1xf32>
    %cst_18 = arith.constant 3.125000e-02 : f32
    %28 = vector.broadcast %cst_18 : f32 to vector<8x1xf32>
    %29 = arith.mulf %27, %28 : vector<8x1xf32>
    %30 = vector.broadcast %29 : vector<8x1xf32> to vector<8x128xf32>
    %31 = arith.subf %25, %30 : vector<8x128xf32>
    %32 = tpu.iota {dimensions = array<i32: 1>} : vector<1x128xi32>
    %c32_i32 = arith.constant 32 : i32
    %33 = vector.broadcast %c32_i32 : i32 to vector<1x128xi32>
    %34 = arith.cmpi slt, %32, %33 : vector<1x128xi32>
    %cst_19 = arith.constant 0.000000e+00 : f32
    %35 = vector.shape_cast %34 : vector<1x128xi1> to vector<1x128xi1>
    %36 = vector.broadcast %35 : vector<1x128xi1> to vector<8x128xi1>
    %37 = vector.broadcast %cst_19 : f32 to vector<8x128xf32>
    %38 = arith.select %36, %31, %37 : vector<8x128xi1>, vector<8x128xf32>
    %39 = arith.mulf %38, %38 : vector<8x128xf32>
    %cst_20 = arith.constant dense<0.000000e+00> : vector<8xf32>
    %40 = vector.multi_reduction <add>, %39, %cst_20 [1] : vector<8x128xf32> to vector<8xf32>
    %41 = vector.shape_cast %40 : vector<8xf32> to vector<8x1xf32>
    %cst_21 = arith.constant 3.125000e-02 : f32
    %42 = vector.broadcast %cst_21 : f32 to vector<8x1xf32>
    %43 = arith.mulf %41, %42 : vector<8x1xf32>
    %cst_22 = arith.constant 9.99999974E-6 : f32
    %44 = vector.broadcast %cst_22 : f32 to vector<8x1xf32>
    %45 = arith.addf %43, %44 : vector<8x1xf32>
    %46 = math.rsqrt %45 : vector<8x1xf32>
    %47 = vector.broadcast %46 : vector<8x1xf32> to vector<8x128xf32>
    %48 = arith.mulf %38, %47 : vector<8x128xf32>
    %49 = vector.broadcast %4 : vector<1x128xf32> to vector<8x128xf32>
    %50 = arith.mulf %48, %49 : vector<8x128xf32>
    %51 = vector.broadcast %5 : vector<1x128xf32> to vector<8x128xf32>
    %52 = arith.addf %50, %51 : vector<8x128xf32>
    %c0_23 = arith.constant 0 : index
    %c0_24 = arith.constant 0 : index
    %53 = vector.load %arg6[%c0_23, %c0_24] : memref<8x128xf32, #tpu.memory_space<vmem>>, vector<8x128xf32>
    tpu.vector_store %arg6[%c0_23, %c0_24], %52 {strides = array<i32>} : memref<8x128xf32, #tpu.memory_space<vmem>>, vector<8x128xf32>,
    return
  }
  func.func @transform_0(%arg0: i32) -> (i32, i32) {
    %c0_i32 = arith.constant 0 : i32
    %c0_i32_0 = arith.constant 0 : i32
    return %arg0, %c0_i32 : i32, i32
  }
  func.func @transform_1(%arg0: i32) -> (i32, i32) {
    %c0_i32 = arith.constant 0 : i32
    %c0_i32_0 = arith.constant 0 : i32
    %c0_i32_1 = arith.constant 0 : i32
    return %c0_i32, %c0_i32_0 : i32, i32
  }
  func.func @transform_2(%arg0: i32) -> (i32, i32) {
    %c0_i32 = arith.constant 0 : i32
    %c0_i32_0 = arith.constant 0 : i32
    %c0_i32_1 = arith.constant 0 : i32
    return %c0_i32, %c0_i32_0 : i32, i32
  }
  func.func @transform_3(%arg0: i32) -> (i32, i32) {
    %c0_i32 = arith.constant 0 : i32
    %c0_i32_0 = arith.constant 0 : i32
    %c0_i32_1 = arith.constant 0 : i32
    return %c0_i32, %c0_i32_0 : i32, i32
  }
  func.func @transform_4(%arg0: i32) -> (i32, i32) {
    %c0_i32 = arith.constant 0 : i32
    %c0_i32_0 = arith.constant 0 : i32
    %c0_i32_1 = arith.constant 0 : i32
    return %c0_i32, %c0_i32_0 : i32, i32
  }
  func.func @transform_5(%arg0: i32) -> (i32, i32) {
    %c0_i32 = arith.constant 0 : i32
    %c0_i32_0 = arith.constant 0 : i32
    return %arg0, %c0_i32 : i32, i32
  }
}

module attributes {stable_mosaic.version = 11 : i64} {
  func.func @_smt_kernel(%arg0: i32, %arg1: memref<8x128xf32, #tpu.memory_space<vmem>>, %arg2: memref<128x128xbf16, #tpu.memory_space<vmem>>, %arg3: memref<128x128xbf16, #tpu.memory_space<vmem>>, %arg4: memref<128x128xbf16, #tpu.memory_space<vmem>>, %arg5: memref<8x128xf32, #tpu.memory_space<vmem>>, %arg6: memref<8x128xf32, #tpu.memory_space<vmem>>) attributes {dimension_semantics = [#tpu.dimension_semantics<parallel>], iteration_bounds = array<i64: 2>, scalar_prefetch = 0 : i64, scratch_operands = 0 : i64, tpu.core_type = #tpu.core_type<tc>, window_params = [{transform_indices = @transform_0, window_bounds = array<i64: 8, 128>}, {pipeline_mode = #tpu.pipeline_mode<synchronous>, transform_indices = @transform_1, window_bounds = array<i64: 128, 128>}, {pipeline_mode = #tpu.pipeline_mode<synchronous>, transform_indices = @transform_2, window_bounds = array<i64: 128, 128>}, {pipeline_mode = #tpu.pipeline_mode<synchronous>, transform_indices = @transform_3, window_bounds = array<i64: 128, 128>}, {pipeline_mode = #tpu.pipeline_mode<synchronous>, transform_indices = @transform_4, window_bounds = array<i64: 8, 128>}, {transform_indices = @transform_5, window_bounds = array<i64: 8, 128>}]} {
    %c0 = arith.constant 0 : index
    %c0_0 = arith.constant 0 : index
    %0 = vector.load %arg1[%c0, %c0_0] : memref<8x128xf32, #tpu.memory_space<vmem>>, vector<8x128xf32>
    %c0_1 = arith.constant 0 : index
    %c0_2 = arith.constant 0 : index
    %1 = vector.load %arg5[%c0_1, %c0_2] : memref<8x128xf32, #tpu.memory_space<vmem>>, vector<1x128xf32>
    %c1 = arith.constant 1 : index
    %c0_3 = arith.constant 0 : index
    %2 = vector.load %arg5[%c1, %c0_3] : memref<8x128xf32, #tpu.memory_space<vmem>>, vector<1x128xf32>
    %c2 = arith.constant 2 : index
    %c0_4 = arith.constant 0 : index
    %3 = vector.load %arg5[%c2, %c0_4] : memref<8x128xf32, #tpu.memory_space<vmem>>, vector<1x128xf32>
    %c3 = arith.constant 3 : index
    %c0_5 = arith.constant 0 : index
    %4 = vector.load %arg5[%c3, %c0_5] : memref<8x128xf32, #tpu.memory_space<vmem>>, vector<1x128xf32>
    %c4 = arith.constant 4 : index
    %c0_6 = arith.constant 0 : index
    %5 = vector.load %arg5[%c4, %c0_6] : memref<8x128xf32, #tpu.memory_space<vmem>>, vector<1x128xf32>
    %6 = arith.truncf %0 : vector<8x128xf32> to vector<8x128xbf16>
    %c0_7 = arith.constant 0 : index
    %c0_8 = arith.constant 0 : index
    %7 = vector.load %arg2[%c0_7, %c0_8] : memref<128x128xbf16, #tpu.memory_space<vmem>>, vector<128x128xbf16>
    %cst = arith.constant dense<0.000000e+00> : vector<8x128xf32>
    %8 = tpu.matmul %6, %7, %cst {dimension_numbers = #tpu.dot_dimension_numbers<[1], [0], [0], [1], [0, 0, 1, 1], [], []>} : vector<8x128xbf16>, vector<128x128xbf16>, vector<8x128xf32> -> vector<8x128xf32>
    %9 = vector.broadcast %1 : vector<1x128xf32> to vector<8x128xf32>
    %10 = arith.addf %8, %9 : vector<8x128xf32>
    %cst_9 = arith.constant 0.000000e+00 : f32
    %11 = vector.broadcast %cst_9 : f32 to vector<8x128xf32>
    %12 = arith.maximumf %10, %11 : vector<8x128xf32>
    %13 = arith.truncf %12 : vector<8x128xf32> to vector<8x128xbf16>
    %c0_10 = arith.constant 0 : index
    %c0_11 = arith.constant 0 : index
    %14 = vector.load %arg3[%c0_10, %c0_11] : memref<128x128xbf16, #tpu.memory_space<vmem>>, vector<128x128xbf16>
    %cst_12 = arith.constant dense<0.000000e+00> : vector<8x128xf32>
    %15 = tpu.matmul %13, %14, %cst_12 {dimension_numbers = #tpu.dot_dimension_numbers<[1], [0], [0], [1], [0, 0, 1, 1], [], []>} : vector<8x128xbf16>, vector<128x128xbf16>, vector<8x128xf32> -> vector<8x128xf32>
    %16 = vector.broadcast %2 : vector<1x128xf32> to vector<8x128xf32>
    %17 = arith.addf %15, %16 : vector<8x128xf32>
    %cst_13 = arith.constant 0.000000e+00 : f32
    %18 = vector.broadcast %cst_13 : f32 to vector<8x128xf32>
    %19 = arith.maximumf %17, %18 : vector<8x128xf32>
    %20 = arith.truncf %19 : vector<8x128xf32> to vector<8x128xbf16>
    %c0_14 = arith.constant 0 : index
    %c0_15 = arith.constant 0 : index
    %21 = vector.load %arg4[%c0_14, %c0_15] : memref<128x128xbf16, #tpu.memory_space<vmem>>, vector<128x128xbf16>
    %cst_16 = arith.constant dense<0.000000e+00> : vector<8x128xf32>
    %22 = tpu.matmul %20, %21, %cst_16 {dimension_numbers = #tpu.dot_dimension_numbers<[1], [0], [0], [1], [0, 0, 1, 1], [], []>} : vector<8x128xbf16>, vector<128x128xbf16>, vector<8x128xf32> -> vector<8x128xf32>
    %23 = vector.broadcast %3 : vector<1x128xf32> to vector<8x128xf32>
    %24 = arith.addf %22, %23 : vector<8x128xf32>
    %25 = arith.addf %24, %0 : vector<8x128xf32>
    %cst_17 = arith.constant dense<0.000000e+00> : vector<8xf32>
    %26 = vector.multi_reduction <add>, %25, %cst_17 [1] : vector<8x128xf32> to vector<8xf32>
    %27 = vector.shape_cast %26 : vector<8xf32> to vector<8x1xf32>
    %cst_18 = arith.constant 3.125000e-02 : f32
    %28 = vector.broadcast %cst_18 : f32 to vector<8x1xf32>
    %29 = arith.mulf %27, %28 : vector<8x1xf32>
    %30 = vector.broadcast %29 : vector<8x1xf32> to vector<8x128xf32>
    %31 = arith.subf %25, %30 : vector<8x128xf32>
    %32 = tpu.iota {dimensions = array<i32: 1>} : vector<1x128xi32>
    %c32_i32 = arith.constant 32 : i32
    %33 = vector.broadcast %c32_i32 : i32 to vector<1x128xi32>
    %34 = arith.cmpi slt, %32, %33 : vector<1x128xi32>
    %cst_19 = arith.constant 0.000000e+00 : f32
    %35 = vector.shape_cast %34 : vector<1x128xi1> to vector<1x128xi1>
    %36 = vector.broadcast %35 : vector<1x128xi1> to vector<8x128xi1>
    %37 = vector.broadcast %cst_19 : f32 to vector<8x128xf32>
    %38 = arith.select %36, %31, %37 : vector<8x128xi1>, vector<8x128xf32>
    %39 = arith.mulf %38, %38 : vector<8x128xf32>
    %cst_20 = arith.constant dense<0.000000e+00> : vector<8xf32>
    %40 = vector.multi_reduction <add>, %39, %cst_20 [1] : vector<8x128xf32> to vector<8xf32>
    %41 = vector.shape_cast %40 : vector<8xf32> to vector<8x1xf32>
    %cst_21 = arith.constant 3.125000e-02 : f32
    %42 = vector.broadcast %cst_21 : f32 to vector<8x1xf32>
    %43 = arith.mulf %41, %42 : vector<8x1xf32>
    %cst_22 = arith.constant 9.99999974E-6 : f32
    %44 = vector.broadcast %cst_22 : f32 to vector<8x1xf32>
    %45 = arith.addf %43, %44 : vector<8x1xf32>
    %46 = math.rsqrt %45 : vector<8x1xf32>
    %47 = vector.broadcast %46 : vector<8x1xf32> to vector<8x128xf32>
    %48 = arith.mulf %38, %47 : vector<8x128xf32>
    %49 = vector.broadcast %4 : vector<1x128xf32> to vector<8x128xf32>
    %50 = arith.mulf %48, %49 : vector<8x128xf32>
    %51 = vector.broadcast %5 : vector<1x128xf32> to vector<8x128xf32>
    %52 = arith.addf %50, %51 : vector<8x128xf32>
    %c0_23 = arith.constant 0 : index
    %c0_24 = arith.constant 0 : index
    %53 = vector.load %arg6[%c0_23, %c0_24] : memref<8x128xf32, #tpu.memory_space<vmem>>, vector<8x128xf32>
    tpu.vector_store %arg6[%c0_23, %c0_24], %52 {strides = array<i32>} : memref<8x128xf32, #tpu.memory_space<vmem>>, vector<8x128xf32>,
    return
  }
  func.func @transform_0(%arg0: i32) -> (i32, i32) {
    %c0_i32 = arith.constant 0 : i32
    %c0_i32_0 = arith.constant 0 : i32
    return %arg0, %c0_i32 : i32, i32
  }
  func.func @transform_1(%arg0: i32) -> (i32, i32) {
    %c0_i32 = arith.constant 0 : i32
    %c0_i32_0 = arith.constant 0 : i32
    %c0_i32_1 = arith.constant 0 : i32
    return %c0_i32, %c0_i32_0 : i32, i32
  }
  func.func @transform_2(%arg0: i32) -> (i32, i32) {
    %c0_i32 = arith.constant 0 : i32
    %c0_i32_0 = arith.constant 0 : i32
    %c0_i32_1 = arith.constant 0 : i32
    return %c0_i32, %c0_i32_0 : i32, i32
  }
  func.func @transform_3(%arg0: i32) -> (i32, i32) {
    %c0_i32 = arith.constant 0 : i32
    %c0_i32_0 = arith.constant 0 : i32
    %c0_i32_1 = arith.constant 0 : i32
    return %c0_i32, %c0_i32_0 : i32, i32
  }
  func.func @transform_4(%arg0: i32) -> (i32, i32) {
    %c0_i32 = arith.constant 0 : i32
    %c0_i32_0 = arith.constant 0 : i32
    %c0_i32_1 = arith.constant 0 : i32
    return %c0_i32, %c0_i32_0 : i32, i32
  }
  func.func @transform_5(%arg0: i32) -> (i32, i32) {
    %c0_i32 = arith.constant 0 : i32
    %c0_i32_0 = arith.constant 0 : i32
    return %arg0, %c0_i32 : i32, i32
  }
}

</mosaic_0001>

<bundles_post_ra>
// kernel: tpu_custom_call.1
= control target key start
LH: loop header
LB: loop body
LE: loop exit
PB: predicated region body
PF: predicated region fallthrough
CT: control target
= control target key end

     0   :  { %10 = vsyncpa [#allocation3], 0  ;;  %s1379_s0 = inlined_call_operand.hbm [shape: f32[16,128], index: 0, kind: input, shape index: {}]   ;;  %s1380_s1 = inlined_call_operand.hbm [shape: bf16[128,128], index: 1, kind: input, shape index: {}]   ;;  %s1381_s2 = inlined_call_operand.hbm [shape: bf16[128,128], index: 2, kind: input, shape index: {}]   ;;  %s1382_s3 = inlined_call_operand.hbm [shape: bf16[128,128], index: 3, kind: input, shape index: {}]   ;;  %s1383_s4 = inlined_call_operand.hbm [shape: f32[8,128], index: 4, kind: input, shape index: {}]   ;;  %s1384_s5 = inlined_call_operand.hbm [shape: f32[16,128], index: 5, kind: output, shape index: {}]  }
   0x1   :  { %12 = vsyncpa [#allocation3 + $0x1], 0 }
   0x2   :  { %13 = vsyncpa [#allocation6], 0 }
   0x3   :  { %14 = vsyncpa [#allocation9], 0 }
   0x4   :  { %15 = vsyncpa [#allocation4], 0 }
   0x5   :  { %17 = vsyncpa [#allocation4 + $0x1], 0  ;;  %s1205_s18 = smov 0   ;;  %s1207_s19 = smov 0  }
   0x6   :  { %s1209_s20 = smov 0   ;;  %s1211_s21 = smov 0  }
   0x7 LB: > { %s175_s24 = sshll.u32 %s1380_s1, 4  ;;  %s1229_s25 = sadd.s32 4294967295, %s1167_s21   ;;  %s1167_s21 = sphi %s1211_s21, %s1396_s21   ;;  %s1163_s20 = sphi %s1209_s20, %s1395_s20   ;;  %s1159_s19 = sphi %s1207_s19, %s1394_s19   ;;  %s1155_s18 = sphi %s1205_s18, %s1393_s18   ;;  %s176_s24 = int_to_ptr.hbm [resolvable:$true] %s175_s24 }
   0x8   : > { %p708_p0 = scmp.ge.s32.totalorder %s1167_s21, 1  ;;  %p44_p1 = scmp.eq.s32.totalorder %s1229_s25, 0 }
   0x9   : > { %p164_p2 = scmp.lt.s32.totalorder %s1167_s21, 3  ;;  %s1169_s27 = smov [#allocation5]  }
   0xa   : > { %s177_s28 = sshll.u32 %s1169_s27, 4  ;;  %s203_s6 = sshll.u32 %s1382_s3, 4  ;;  %s178_s28 = int_to_ptr.vmem [resolvable:$true] %s177_s28  ;;  %s204_s6 = int_to_ptr.hbm [resolvable:$true] %s203_s6 }
   0xb   : > { %p1234_p3 = pnand %p708_p0, %p164_p2  ;;  %s189_s10 = sshll.u32 %s1381_s2, 4  ;;  %s190_s10 = int_to_ptr.hbm [resolvable:$true] %s189_s10 }
   0xc   : > { %s1170_s11 = smov [#allocation8]   ;;  %s1171_s13 = smov 64  }
   0xd   : > { %p867_p4 = pneg %p1234_p3  ;;  %s205_s12 = sshll.u32 %s1170_s11, 4  ;;  %s206_s12 = int_to_ptr.vmem [resolvable:$true] %s205_s12 }
   0xe   : > { %s1172_s14 = smov 4   ;;  %s218_s17 = sshll.u32 %s1383_s4, 4  ;;  %s219_s17 = int_to_ptr.hbm [resolvable:$true] %s218_s17 }
   0xf   : > { %p1246_p6 = pnand %p867_p4, %p44_p1  ;;  %s1173_s22 = smov [#allocation7]  }
  0x10   : > { %s191_s23 = sshll.u32 %s1173_s22, 4  ;;  %s1266_s29 = sadd.s32 1, %s1167_s21   ;;  %s192_s23 = int_to_ptr.vmem [resolvable:$true] %s191_s23 }
  0x11   : > { %870 = dma.hbm_to_vmem [thread:$0]  (!%p1246_p6), %s176_s24, 1024, %s178_s28, [#allocation6], %s1171_s13, %s1171_s13, %s1172_s14  }
  0x12   : > { %876 = dma.hbm_to_vmem [thread:$0]  (!%p1246_p6), %s204_s6, 1024, %s206_s12, [#allocation9], %s1171_s13, %s1171_s13, %s1172_s14  }
  0x13   : > { %873 = dma.hbm_to_vmem [thread:$0]  (!%p1246_p6), %s190_s10, 1024, %s192_s23, [#allocation6], %s1171_s13, %s1171_s13, %s1172_s14  }
  0x14   : > { %s1174_s24 = smov [#allocation10]   ;;  %s707_s28 = sadd.s32 4294967294, %s1167_s21  }
  0x15   : > { %s220_s27 = sshll.u32 %s1174_s24, 4  ;;  %s27_s30 = ssub.s32 %s1167_s21, %s1266_s29  ;;  %s221_s27 = int_to_ptr.vmem [resolvable:$true] %s220_s27 }
  0x16   : > { %879 = dma.hbm_to_vmem [thread:$0]  (!%p1246_p6), %s219_s17, 128, %s221_s27, [#allocation9]  }
  0x17   : > { %s30_s6 = sadd.s32 1, %s1163_s20  ;;  %p28_p7 = scmp.eq.s32.totalorder %s27_s30, 0 }
  0x18   : > { %p37_p8 = scmp.ne.s32.totalorder %s1163_s20, %s1159_s19  ;;  %p38_p9 = scmp.eq.s32.totalorder %s1167_s21, 0 }
  0x19   : > { %p43_p10 = scmp.ne.s32.totalorder %s1159_s19, %s1155_s18  ;;  %p151_p13 = scmp.eq.s32.totalorder %s1229_s25, 1 }
  0x1a   : > { %s1277_s8 = scalar_select %p28_p7, %s1163_s20, %s30_s6  }
  0x1b   : > { %p1279_p11 = por %p38_p9, %p37_p8  ;;  %p1285_p12 = por %p44_p1, %p43_p10 }
  0x1c   : > { %p157_p0 = scmp.eq.s32.totalorder %s707_s28, 1  ;;  %p892_p2 = scmp.lt.s32.totalorder %s1167_s21, 2 }
  0x1d   : > { %s231_s10 = sand.u32 1, %s1163_s20   ;;  %p1292_p4 = por %p151_p13, %p37_p8 }
  0x1e   : > { %p1296_p6 = por %p157_p0, %p43_p10  ;;  %s714_s13 = sshll.u32 %s231_s10, 3 }
  0x1f   : > { %s715_s14 = sshll.u32 %s1167_s21, 3  ;;  %s235_s22 = scalar_lea.vmem [#allocation2], %s714_s13 }
  0x20   : > { %s239_s17 = scalar_lea.hbm %s1379_s0, %s715_s14  ;;  %s243_s23 = sshll.u32 %s235_s22, 4  ;;  %s244_s23 = int_to_ptr.vmem [resolvable:$true] %s243_s23 }
  0x21   : > { %s241_s24 = sshll.u32 %s239_s17, 4  ;;  %p1306_p7 = pnand %p892_p2, %p1279_p11  ;;  %s242_s24 = int_to_ptr.hbm [resolvable:$true] %s241_s24 }
  0x22   : > { %s232_s28 = scalar_lea.sflag [#allocation3], %s231_s10  ;;  %s1063_s30 = sshra.s32 %s242_s24, 4  ;;  %s1064_s30 = int_to_ptr.hbm [resolvable:$true] %s1063_s30 }
  0x23   : > { %s1065_s6 = scalar_lea.hbm %s1064_s30, 8  ;;  %p1067_p9 = pneg %p1306_p7 }
  0x24   : > { %p1066_p8 = scmp.ne.s32.totalorder %s1064_s30, %s1065_s6  ;;  %s1070_s15 = scalar_lea.hbm %s1379_s0, 16 }
  0x25   : > { %p1071_p11 = scmp.lt.s32.totalorder %s1064_s30, %s1379_s0  ;;  %p1072_p0 = scmp.lt.s32.totalorder %s1070_s15, %s1065_s6 }
  0x26   : > { %p1068_p10 = pnand %p1067_p9, %p1066_p8 }
  0x27   : > { %p1073_p2 = por %p1072_p0, %p1071_p11 }
  0x28   : > { %p1069_p13 = pneg %p1068_p10 }
  0x2a   : > { %p1074_p5 = pnand %p1073_p2, %p1069_p13 }
  0x2c   : > { %1077 = shalt.err (!%p1074_p5)
}
  0x2d   : > { %883 = dma.hbm_to_vmem [thread:$0]  (!%p1306_p7), %s242_s24, 128, %s244_s23, %s232_s28  }
  0x2e   : > { %252 = sbr.rel (%p1234_p3) target bundleno = 758 (0x2f6), region = 40  ;;  %s1323_s10 = sand.u32 (!%p1234_p3), 1, %s1159_s19  }
  0x2f   : > { %s717_s17 = sshll.u32 (!%p1234_p3), %s1323_s10, 3  ;;  %s255_s22 = scalar_lea.sflag (!%p1234_p3), [#allocation3], %s1323_s10 }
  0x30   : > { %s1329_s30 = scalar_lea.vmem (!%p1234_p3), [#allocation2], %s717_s17 }
  0x33   : > { %1138 = dma.done.wait (%p1285_p12), %s255_s22, 128  }
  0x34   : > { %1140 = vsyncadd (%p1285_p12), %s255_s22, 4294967168 }
  0x35   : > { %1142 = dma.done.wait (%p44_p1), [#allocation6], 2048  }
  0x36   : > { %1144 = vsyncadd (%p44_p1), [#allocation6], 4294965248 }
  0x37   : > { %1146 = dma.done.wait (%p44_p1), [#allocation9], 1152  }
  0x38   : > { %1148 = vsyncadd (%p44_p1), [#allocation9], 4294966144  ;;  %v830_v0 = vld [vmem:[#allocation5 + $0x38] sm:$0xff]  ;;  %v829_v1 = vld [vmem:[#allocation5 + $0x30] sm:$0xff]  ;;  %v556_v43 = vlaneseq  ;;  %s820_s26 = sshll.u32 %s1229_s25, 3  ;;  %s305_s27 = scalar_lea.vmem [#allocation11], %s717_s17 }
  0x39   : > { %378 = vmatpush.bf16.msra.mxu0 %v830_v0  ;;  %v838_v2 = vld [vmem:[#allocation7 + $0x38] sm:$0xff]  ;;  %v828_v3 = vld [vmem:[#allocation5 + $0x28] sm:$0xff]  ;;  %v837_v4 = vld [vmem:[#allocation7 + $0x30] sm:$0xff]  ;;  %s594_s24 = scalar_lea.hbm %s1384_s5, %s820_s26  ;;  %s596_s28 = sshll.u32 %s305_s27, 4  ;;  %s597_s28 = int_to_ptr.vmem [resolvable:$true] %s596_s28 }
  0x3a   : > { %458 = vmatpush.bf16.msra.mxu1 %v838_v2  ;;  %v836_v5 = vld [vmem:[#allocation7 + $0x28] sm:$0xff]  ;;  %v827_v6 = vld [vmem:[#allocation5 + $0x20] sm:$0xff]  ;;  %v826_v8 = vld [vmem:[#allocation5 + $0x18] sm:$0xff]  ;;  %v557_v44 = vand.u32 127, %v556_v43  ;;  %s598_s6 = sshll.u32 %s594_s24, 4  ;;  %s584_s25 = scalar_lea.sflag [#allocation4], %s1323_s10  ;;  %s599_s6 = int_to_ptr.hbm [resolvable:$true] %s598_s6 }
  0x3b   : > { %v835_v7 = vld [vmem:[#allocation7 + $0x20] sm:$0xff]  ;;  %v834_v9 = vld [vmem:[#allocation7 + $0x18] sm:$0xff]  ;;  %v825_v10 = vld [vmem:[#allocation5 + $0x10] sm:$0xff]  ;;  %s1107_s13 = sshra.s32 %s599_s6, 4  ;;  %s1113_s9 = scalar_lea.hbm %s1384_s5, 16  ;;  %s1108_s13 = int_to_ptr.hbm [resolvable:$true] %s1107_s13 }
  0x3c   : > { %v833_v11 = vld [vmem:[#allocation7 + $0x10] sm:$0xff]  ;;  %v824_v12 = vld [vmem:[#allocation5 + $0x8] sm:$0xff]  ;;  %v823_v13 = vld [vmem:[#allocation5] sm:$0xff]  ;;  %vm558_vm0 = vcmp.lt.s32.totalorder %v557_v44, 32  ;;  %s1109_s14 = scalar_lea.hbm %s1108_s13, 8  ;;  %p1114_p12 = scmp.lt.s32.totalorder %s1108_s13, %s1384_s5 }
  0x3d   : > { %379 = vmatpush.bf16.msra.mxu0 %v829_v1  ;;  %v306_v14 = vld [vmem:[%s1329_s30] sm:$0xff]  ;;  %v832_v16 = vld [vmem:[#allocation7 + $0x8] sm:$0xff]  ;;  %v831_v17 = vld [vmem:[#allocation7] sm:$0xff]  ;;  %p1110_p1 = scmp.ne.s32.totalorder %s1108_s13, %s1109_s14  ;;  %p1115_p7 = scmp.lt.s32.totalorder %s1113_s9, %s1109_s14 }
  0x3e   : > { %459 = vmatpush.bf16.msra.mxu1 %v837_v4  ;;  %v312_v15 = vpack.c.bf16 %v306_v14, %v306_v14  ;;  %v846_v18 = vld [vmem:[#allocation8 + $0x38] sm:$0xff]  ;;  %v845_v19 = vld [vmem:[#allocation8 + $0x30] sm:$0xff]  ;;  %v844_v20 = vld [vmem:[#allocation8 + $0x28] sm:$0xff] }
  0x3f   : > { %538 = vmatpush.bf16.msra.mxu2 %v846_v18  ;;  %v843_v21 = vld [vmem:[#allocation8 + $0x20] sm:$0xff]  ;;  %v842_v22 = vld [vmem:[#allocation8 + $0x18] sm:$0xff]  ;;  %v841_v23 = vld [vmem:[#allocation8 + $0x10] sm:$0xff]  ;;  %p1111_p3 = pnand %p1110_p1, %p1292_p4  ;;  %p1116_p8 = por %p1115_p7, %p1114_p12 }
  0x40   : > { %v936_v24 = vld [vmem:[#allocation10] ss:$0 sm:$0xff]  ;;  %v840_v30 = vld [vmem:[#allocation8 + $0x8] sm:$0xff]  ;;  %v937_v32 = vld [vmem:[#allocation10 + $0x1] ss:$0 sm:$0xff] }
  0x41   : > { %380 = vmatpush.bf16.msra.mxu0 %v828_v3  ;;  %v839_v31 = vld [vmem:[#allocation8] sm:$0xff]  ;;  %p1112_p5 = pneg %p1111_p3 }
  0x42   : > { %460 = vmatpush.bf16.msra.mxu1 %v836_v5  ;;  %v938_v38 = vld [vmem:[#allocation10 + $0x2] ss:$0 sm:$0xff]  ;;  %v939_v59 = vld [vmem:[#allocation10 + $0x3] ss:$0 sm:$0xff]  ;;  %v940_v62 = vld [vmem:[#allocation10 + $0x4] ss:$0 sm:$0xff] }
  0x43   : > { %539 = vmatpush.bf16.msra.mxu2 %v845_v19  ;;  %p1117_p9 = pnand %p1116_p8, %p1112_p5 }
  0x45   : > { %381 = vmatpush.bf16.msra.mxu0 %v827_v6 }
  0x46   : > { %461 = vmatpush.bf16.msra.mxu1 %v835_v7 }
  0x47   : > { %540 = vmatpush.bf16.msra.mxu2 %v844_v20 }
  0x49   : > { %382 = vmatpush.bf16.msra.mxu0 %v826_v8 }
  0x4a   : > { %462 = vmatpush.bf16.msra.mxu1 %v834_v9 }
  0x4b   : > { %541 = vmatpush.bf16.msra.mxu2 %v843_v21 }
  0x4d   : > { %383 = vmatpush.bf16.msra.mxu0 %v825_v10 }
  0x4e   : > { %463 = vmatpush.bf16.msra.mxu1 %v833_v11 }
  0x4f   : > { %542 = vmatpush.bf16.msra.mxu2 %v842_v22 }
  0x51   : > { %384 = vmatpush.bf16.msra.mxu0 %v824_v12 }
  0x52   : > { %464 = vmatpush.bf16.msra.mxu1 %v832_v16 }
  0x53   : > { %543 = vmatpush.bf16.msra.mxu2 %v841_v23 }
  0x55   : > { %385 = vmatpush.bf16.msra.mxu0 %v823_v13 }
  0x56   : > { %465 = vmatpush.bf16.msra.mxu1 %v831_v17 }
  0x57   : > { %544 = vmatpush.bf16.msra.mxu2 %v840_v30 }
  0x58   : > { %386 = vmatmul.bf16.vlgmr.msra.gmra.mxu0 %v312_v15 }
  0x5b   : > { %545 = vmatpush.bf16.msra.mxu2 %v839_v31 }
  0xd5   : > { %v387_v25 = vpop.f32.mrf.mxu0 }
  0xd6   : > { %v388_v26 = vadd.f32 %v936_v24, %v387_v25 }
  0xd8   : > { %v391_v27 = vmax.f32 %v388_v26, 0.0 }
  0xda   : > { %v392_v28 = vpack.c.bf16 %v391_v27, %v391_v27 }
  0xdc   : > { %466 = vmatmul.bf16.vlgmr.msra.gmra.mxu1 %v392_v28 }
  0xdd   : > { %v389_v29 = vpop.f32.mrf.mxu0 }
 0x159   : > { %v467_v33 = vpop.f32.mrf.mxu1 }
 0x15a   : > { %v468_v34 = vadd.f32 %v937_v32, %v467_v33 }
 0x15c   : > { %v471_v35 = vmax.f32 %v468_v34, 0.0 }
 0x15e   : > { %v472_v36 = vpack.c.bf16 %v471_v35, %v471_v35 }
 0x160   : > { %546 = vmatmul.bf16.vlgmr.msra.gmra.mxu2 %v472_v36 }
 0x161   : > { %v469_v37 = vpop.f32.mrf.mxu1 }
 0x1e3   : > { %v547_v39 = vpop.f32.mrf.mxu2 }
 0x1e4   : > { %v548_v40 = vadd.f32 %v938_v38, %v547_v39 }
 0x1e6   : > { %v551_v41 = vadd.f32 %v548_v40, %v306_v14 }
 0x1e8   : > { %552 = vadd.xlane.f32.xlu0 %v551_v41 }
 0x1eb   : > { %v549_v42 = vpop.f32.mrf.mxu2 }
 0x25b   : > { %v553_v45 = vpop.xlane.xlu0 %552 }
 0x25c   : > { %v554_v46 = vmul.f32 0.03125, %v553_v45 }
 0x25e   : > { %v555_v47 = vsub.f32 %v551_v41, %v554_v46 }
 0x260   : > { %v561_v48 = vsel %vm558_vm0, %v555_v47, 0.0 }
 0x261   : > { %v562_v49 = vmul.f32 %v561_v48, %v561_v48 }
 0x263   : > { %563 = vadd.xlane.f32.xlu0 %v562_v49 }
 0x2d6   : > { %v564_v50 = vpop.xlane.xlu0 %563 }
 0x2d7   : > { %v565_v51 = vmul.f32 0.03125, %v564_v50 }
 0x2d9   : > { %v566_v52 = vadd.f32 1e-05, %v565_v51 }
 0x2db   : > { %941 = vrsqrt.f32 %v566_v52  ;;  %vm573_vm2 = vweird.f32 %v566_v52 }
 0x2e1   : > { %v942_v53 = vpop.eup %941 }
 0x2e2   : > { %v568_v54 = vmul.f32 %v942_v53, %v566_v52  ;;  %vm574_vm1 = vweird.f32 %v942_v53 }
 0x2e3   : > { %vm575_vm3 = vmor %vm573_vm2, %vm574_vm1 }
 0x2e4   : > { %v569_v55 = vmul.f32 %v942_v53, %v568_v54 }
 0x2e6   : > { %v570_v56 = vmul.f32 0.5, %v569_v55 }
 0x2e8   : > { %v571_v57 = vsub.f32 1.5, %v570_v56 }
 0x2ea   : > { %v572_v58 = vmul.f32 %v942_v53, %v571_v57 }
 0x2ec   : > { %v576_v60 = vsel %vm575_vm3, %v942_v53, %v572_v58 }
 0x2ed   : > { %v577_v61 = vmul.f32 %v576_v60, %v561_v48 }
 0x2ef   : > { %v579_v63 = vmul.f32 %v939_v59, %v577_v61 }
 0x2f1   : > { %v581_v0 = vadd.f32 %v940_v62, %v579_v63 }
 0x2f3   : > { %582 = vst [vmem:[%s305_s27] sm:$0xff] %v581_v0 }
 0x2f4   : > { %1120 = shalt.err (!%p1117_p9)
}
 0x2f5   : > { %865 = dma.vmem_to_hbm [thread:$0]  (%p1292_p4), %s597_s28, 128, %s599_s6, %s584_s25  }
 0x2f6 PF: > { %s610_s10 = sand.u32 1, %s1155_s18   ;;  %p1392_p10 = scmp.ge.s32.totalorder %s1167_s21, 2 }
 0x2f7   : > { %s611_s30 = scalar_lea.sflag [#allocation4], %s610_s10 }
 0x2f8   : > { %p885_p13 = pnand %p1392_p10, %p1296_p6 }
 0x2fa   : > { %p886_p11 = pneg %p885_p13 }
 0x2fc   : > { %1150 = dma.done.wait (%p886_p11), %s611_s30, 128  }
 0x2fd   : > { %1152 = vsyncadd (%p886_p11), %s611_s30, 4294967168  ;;  %p20_p0 = scmp.ge.s32.totalorder %s1266_s29, 4   ;;  %s1393_s18 = smov %s1159_s19 }
 0x2fe   : > { %s1394_s19 = smov %s1163_s20  ;;  %s1395_s20 = smov %s1277_s8 }
 0x2ff   : > { %s1396_s21 = smov %s1266_s29  ;;  %22 = sbr.rel (!%p20_p0) target bundleno = 7 (0x7), region = 101 }
 0x304   :  { %617 = vsyncpa [#allocation3], 1 }
 0x305   :  { %619 = vsyncpa [#allocation3 + $0x1], 1 }
 0x306   :  { %620 = vsyncpa [#allocation6], 1 }
 0x307   :  { %621 = vsyncpa [#allocation9], 1 }
 0x308   :  { %622 = vsyncpa [#allocation4], 1 }
 0x309   :  { %624 = vsyncpa [#allocation4 + $0x1], 1 }

// kernel: tpu_custom_call.1
= control target key start
LH: loop header
LB: loop body
LE: loop exit
PB: predicated region body
PF: predicated region fallthrough
CT: control target
= control target key end

     0   :  { %10 = vsyncpa [#allocation3], 0  ;;  %s1379_s0 = inlined_call_operand.hbm [shape: f32[16,128], index: 0, kind: input, shape index: {}]   ;;  %s1380_s1 = inlined_call_operand.hbm [shape: bf16[128,128], index: 1, kind: input, shape index: {}]   ;;  %s1381_s2 = inlined_call_operand.hbm [shape: bf16[128,128], index: 2, kind: input, shape index: {}]   ;;  %s1382_s3 = inlined_call_operand.hbm [shape: bf16[128,128], index: 3, kind: input, shape index: {}]   ;;  %s1383_s4 = inlined_call_operand.hbm [shape: f32[8,128], index: 4, kind: input, shape index: {}]   ;;  %s1384_s5 = inlined_call_operand.hbm [shape: f32[16,128], index: 5, kind: output, shape index: {}]  }
   0x1   :  { %12 = vsyncpa [#allocation3 + $0x1], 0 }
   0x2   :  { %13 = vsyncpa [#allocation6], 0 }
   0x3   :  { %14 = vsyncpa [#allocation9], 0 }
   0x4   :  { %15 = vsyncpa [#allocation4], 0 }
   0x5   :  { %17 = vsyncpa [#allocation4 + $0x1], 0  ;;  %s1205_s18 = smov 0   ;;  %s1207_s19 = smov 0  }
   0x6   :  { %s1209_s20 = smov 0   ;;  %s1211_s21 = smov 0  }
   0x7 LB: > { %s175_s24 = sshll.u32 %s1380_s1, 4  ;;  %s1229_s25 = sadd.s32 4294967295, %s1167_s21   ;;  %s1167_s21 = sphi %s1211_s21, %s1396_s21   ;;  %s1163_s20 = sphi %s1209_s20, %s1395_s20   ;;  %s1159_s19 = sphi %s1207_s19, %s1394_s19   ;;  %s1155_s18 = sphi %s1205_s18, %s1393_s18   ;;  %s176_s24 = int_to_ptr.hbm [resolvable:$true] %s175_s24 }
   0x8   : > { %p708_p0 = scmp.ge.s32.totalorder %s1167_s21, 1  ;;  %p44_p1 = scmp.eq.s32.totalorder %s1229_s25, 0 }
   0x9   : > { %p164_p2 = scmp.lt.s32.totalorder %s1167_s21, 3  ;;  %s1169_s27 = smov [#allocation5]  }
   0xa   : > { %s177_s28 = sshll.u32 %s1169_s27, 4  ;;  %s203_s6 = sshll.u32 %s1382_s3, 4  ;;  %s178_s28 = int_to_ptr.vmem [resolvable:$true] %s177_s28  ;;  %s204_s6 = int_to_ptr.hbm [resolvable:$true] %s203_s6 }
   0xb   : > { %p1234_p3 = pnand %p708_p0, %p164_p2  ;;  %s189_s10 = sshll.u32 %s1381_s2, 4  ;;  %s190_s10 = int_to_ptr.hbm [resolvable:$true] %s189_s10 }
   0xc   : > { %s1170_s11 = smov [#allocation8]   ;;  %s1171_s13 = smov 64  }
   0xd   : > { %p867_p4 = pneg %p1234_p3  ;;  %s205_s12 = sshll.u32 %s1170_s11, 4  ;;  %s206_s12 = int_to_ptr.vmem [resolvable:$true] %s205_s12 }
   0xe   : > { %s1172_s14 = smov 4   ;;  %s218_s17 = sshll.u32 %s1383_s4, 4  ;;  %s219_s17 = int_to_ptr.hbm [resolvable:$true] %s218_s17 }
   0xf   : > { %p1246_p6 = pnand %p867_p4, %p44_p1  ;;  %s1173_s22 = smov [#allocation7]  }
  0x10   : > { %s191_s23 = sshll.u32 %s1173_s22, 4  ;;  %s1266_s29 = sadd.s32 1, %s1167_s21   ;;  %s192_s23 = int_to_ptr.vmem [resolvable:$true] %s191_s23 }
  0x11   : > { %870 = dma.hbm_to_vmem [thread:$0]  (!%p1246_p6), %s176_s24, 1024, %s178_s28, [#allocation6], %s1171_s13, %s1171_s13, %s1172_s14  }
  0x12   : > { %876 = dma.hbm_to_vmem [thread:$0]  (!%p1246_p6), %s204_s6, 1024, %s206_s12, [#allocation9], %s1171_s13, %s1171_s13, %s1172_s14  }
  0x13   : > { %873 = dma.hbm_to_vmem [thread:$0]  (!%p1246_p6), %s190_s10, 1024, %s192_s23, [#allocation6], %s1171_s13, %s1171_s13, %s1172_s14  }
  0x14   : > { %s1174_s24 = smov [#allocation10]   ;;  %s707_s28 = sadd.s32 4294967294, %s1167_s21  }
  0x15   : > { %s220_s27 = sshll.u32 %s1174_s24, 4  ;;  %s27_s30 = ssub.s32 %s1167_s21, %s1266_s29  ;;  %s221_s27 = int_to_ptr.vmem [resolvable:$true] %s220_s27 }
  0x16   : > { %879 = dma.hbm_to_vmem [thread:$0]  (!%p1246_p6), %s219_s17, 128, %s221_s27, [#allocation9]  }
  0x17   : > { %s30_s6 = sadd.s32 1, %s1163_s20  ;;  %p28_p7 = scmp.eq.s32.totalorder %s27_s30, 0 }
  0x18   : > { %p37_p8 = scmp.ne.s32.totalorder %s1163_s20, %s1159_s19  ;;  %p38_p9 = scmp.eq.s32.totalorder %s1167_s21, 0 }
  0x19   : > { %p43_p10 = scmp.ne.s32.totalorder %s1159_s19, %s1155_s18  ;;  %p151_p13 = scmp.eq.s32.totalorder %s1229_s25, 1 }
  0x1a   : > { %s1277_s8 = scalar_select %p28_p7, %s1163_s20, %s30_s6  }
  0x1b   : > { %p1279_p11 = por %p38_p9, %p37_p8  ;;  %p1285_p12 = por %p44_p1, %p43_p10 }
  0x1c   : > { %p157_p0 = scmp.eq.s32.totalorder %s707_s28, 1  ;;  %p892_p2 = scmp.lt.s32.totalorder %s1167_s21, 2 }
  0x1d   : > { %s231_s10 = sand.u32 1, %s1163_s20   ;;  %p1292_p4 = por %p151_p13, %p37_p8 }
  0x1e   : > { %p1296_p6 = por %p157_p0, %p43_p10  ;;  %s714_s13 = sshll.u32 %s231_s10, 3 }
  0x1f   : > { %s715_s14 = sshll.u32 %s1167_s21, 3  ;;  %s235_s22 = scalar_lea.vmem [#allocation2], %s714_s13 }
  0x20   : > { %s239_s17 = scalar_lea.hbm %s1379_s0, %s715_s14  ;;  %s243_s23 = sshll.u32 %s235_s22, 4  ;;  %s244_s23 = int_to_ptr.vmem [resolvable:$true] %s243_s23 }
  0x21   : > { %s241_s24 = sshll.u32 %s239_s17, 4  ;;  %p1306_p7 = pnand %p892_p2, %p1279_p11  ;;  %s242_s24 = int_to_ptr.hbm [resolvable:$true] %s241_s24 }
  0x22   : > { %s232_s28 = scalar_lea.sflag [#allocation3], %s231_s10  ;;  %s1063_s30 = sshra.s32 %s242_s24, 4  ;;  %s1064_s30 = int_to_ptr.hbm [resolvable:$true] %s1063_s30 }
  0x23   : > { %s1065_s6 = scalar_lea.hbm %s1064_s30, 8  ;;  %p1067_p9 = pneg %p1306_p7 }
  0x24   : > { %p1066_p8 = scmp.ne.s32.totalorder %s1064_s30, %s1065_s6  ;;  %s1070_s15 = scalar_lea.hbm %s1379_s0, 16 }
  0x25   : > { %p1071_p11 = scmp.lt.s32.totalorder %s1064_s30, %s1379_s0  ;;  %p1072_p0 = scmp.lt.s32.totalorder %s1070_s15, %s1065_s6 }
  0x26   : > { %p1068_p10 = pnand %p1067_p9, %p1066_p8 }
  0x27   : > { %p1073_p2 = por %p1072_p0, %p1071_p11 }
  0x28   : > { %p1069_p13 = pneg %p1068_p10 }
  0x2a   : > { %p1074_p5 = pnand %p1073_p2, %p1069_p13 }
  0x2c   : > { %1077 = shalt.err (!%p1074_p5)
}
  0x2d   : > { %883 = dma.hbm_to_vmem [thread:$0]  (!%p1306_p7), %s242_s24, 128, %s244_s23, %s232_s28  }
  0x2e   : > { %252 = sbr.rel (%p1234_p3) target bundleno = 758 (0x2f6), region = 40  ;;  %s1323_s10 = sand.u32 (!%p1234_p3), 1, %s1159_s19  }
  0x2f   : > { %s717_s17 = sshll.u32 (!%p1234_p3), %s1323_s10, 3  ;;  %s255_s22 = scalar_lea.sflag (!%p1234_p3), [#allocation3], %s1323_s10 }
  0x30   : > { %s1329_s30 = scalar_lea.vmem (!%p1234_p3), [#allocation2], %s717_s17 }
  0x33   : > { %1138 = dma.done.wait (%p1285_p12), %s255_s22, 128  }
  0x34   : > { %1140 = vsyncadd (%p1285_p12), %s255_s22, 4294967168 }
  0x35   : > { %1142 = dma.done.wait (%p44_p1), [#allocation6], 2048  }
  0x36   : > { %1144 = vsyncadd (%p44_p1), [#allocation6], 4294965248 }
  0x37   : > { %1146 = dma.done.wait (%p44_p1), [#allocation9], 1152  }
  0x38   : > { %1148 = vsyncadd (%p44_p1), [#allocation9], 4294966144  ;;  %v830_v0 = vld [vmem:[#allocation5 + $0x38] sm:$0xff]  ;;  %v829_v1 = vld [vmem:[#allocation5 + $0x30] sm:$0xff]  ;;  %v556_v43 = vlaneseq  ;;  %s820_s26 = sshll.u32 %s1229_s25, 3  ;;  %s305_s27 = scalar_lea.vmem [#allocation11], %s717_s17 }
  0x39   : > { %378 = vmatpush.bf16.msra.mxu0 %v830_v0  ;;  %v838_v2 = vld [vmem:[#allocation7 + $0x38] sm:$0xff]  ;;  %v828_v3 = vld [vmem:[#allocation5 + $0x28] sm:$0xff]  ;;  %v837_v4 = vld [vmem:[#allocation7 + $0x30] sm:$0xff]  ;;  %s594_s24 = scalar_lea.hbm %s1384_s5, %s820_s26  ;;  %s596_s28 = sshll.u32 %s305_s27, 4  ;;  %s597_s28 = int_to_ptr.vmem [resolvable:$true] %s596_s28 }
  0x3a   : > { %458 = vmatpush.bf16.msra.mxu1 %v838_v2  ;;  %v836_v5 = vld [vmem:[#allocation7 + $0x28] sm:$0xff]  ;;  %v827_v6 = vld [vmem:[#allocation5 + $0x20] sm:$0xff]  ;;  %v826_v8 = vld [vmem:[#allocation5 + $0x18] sm:$0xff]  ;;  %v557_v44 = vand.u32 127, %v556_v43  ;;  %s598_s6 = sshll.u32 %s594_s24, 4  ;;  %s584_s25 = scalar_lea.sflag [#allocation4], %s1323_s10  ;;  %s599_s6 = int_to_ptr.hbm [resolvable:$true] %s598_s6 }
  0x3b   : > { %v835_v7 = vld [vmem:[#allocation7 + $0x20] sm:$0xff]  ;;  %v834_v9 = vld [vmem:[#allocation7 + $0x18] sm:$0xff]  ;;  %v825_v10 = vld [vmem:[#allocation5 + $0x10] sm:$0xff]  ;;  %s1107_s13 = sshra.s32 %s599_s6, 4  ;;  %s1113_s9 = scalar_lea.hbm %s1384_s5, 16  ;;  %s1108_s13 = int_to_ptr.hbm [resolvable:$true] %s1107_s13 }
  0x3c   : > { %v833_v11 = vld [vmem:[#allocation7 + $0x10] sm:$0xff]  ;;  %v824_v12 = vld [vmem:[#allocation5 + $0x8] sm:$0xff]  ;;  %v823_v13 = vld [vmem:[#allocation5] sm:$0xff]  ;;  %vm558_vm0 = vcmp.lt.s32.totalorder %v557_v44, 32  ;;  %s1109_s14 = scalar_lea.hbm %s1108_s13, 8  ;;  %p1114_p12 = scmp.lt.s32.totalorder %s1108_s13, %s1384_s5 }
  0x3d   : > { %379 = vmatpush.bf16.msra.mxu0 %v829_v1  ;;  %v306_v14 = vld [vmem:[%s1329_s30] sm:$0xff]  ;;  %v832_v16 = vld [vmem:[#allocation7 + $0x8] sm:$0xff]  ;;  %v831_v17 = vld [vmem:[#allocation7] sm:$0xff]  ;;  %p1110_p1 = scmp.ne.s32.totalorder %s1108_s13, %s1109_s14  ;;  %p1115_p7 = scmp.lt.s32.totalorder %s1113_s9, %s1109_s14 }
  0x3e   : > { %459 = vmatpush.bf16.msra.mxu1 %v837_v4  ;;  %v312_v15 = vpack.c.bf16 %v306_v14, %v306_v14  ;;  %v846_v18 = vld [vmem:[#allocation8 + $0x38] sm:$0xff]  ;;  %v845_v19 = vld [vmem:[#allocation8 + $0x30] sm:$0xff]  ;;  %v844_v20 = vld [vmem:[#allocation8 + $0x28] sm:$0xff] }
  0x3f   : > { %538 = vmatpush.bf16.msra.mxu2 %v846_v18  ;;  %v843_v21 = vld [vmem:[#allocation8 + $0x20] sm:$0xff]  ;;  %v842_v22 = vld [vmem:[#allocation8 + $0x18] sm:$0xff]  ;;  %v841_v23 = vld [vmem:[#allocation8 + $0x10] sm:$0xff]  ;;  %p1111_p3 = pnand %p1110_p1, %p1292_p4  ;;  %p1116_p8 = por %p1115_p7, %p1114_p12 }
  0x40   : > { %v936_v24 = vld [vmem:[#allocation10] ss:$0 sm:$0xff]  ;;  %v840_v30 = vld [vmem:[#allocation8 + $0x8] sm:$0xff]  ;;  %v937_v32 = vld [vmem:[#allocation10 + $0x1] ss:$0 sm:$0xff] }
  0x41   : > { %380 = vmatpush.bf16.msra.mxu0 %v828_v3  ;;  %v839_v31 = vld [vmem:[#allocation8] sm:$0xff]  ;;  %p1112_p5 = pneg %p1111_p3 }
  0x42   : > { %460 = vmatpush.bf16.msra.mxu1 %v836_v5  ;;  %v938_v38 = vld [vmem:[#allocation10 + $0x2] ss:$0 sm:$0xff]  ;;  %v939_v59 = vld [vmem:[#allocation10 + $0x3] ss:$0 sm:$0xff]  ;;  %v940_v62 = vld [vmem:[#allocation10 + $0x4] ss:$0 sm:$0xff] }
  0x43   : > { %539 = vmatpush.bf16.msra.mxu2 %v845_v19  ;;  %p1117_p9 = pnand %p1116_p8, %p1112_p5 }
  0x45   : > { %381 = vmatpush.bf16.msra.mxu0 %v827_v6 }
  0x46   : > { %461 = vmatpush.bf16.msra.mxu1 %v835_v7 }
  0x47   : > { %540 = vmatpush.bf16.msra.mxu2 %v844_v20 }
  0x49   : > { %382 = vmatpush.bf16.msra.mxu0 %v826_v8 }
  0x4a   : > { %462 = vmatpush.bf16.msra.mxu1 %v834_v9 }
  0x4b   : > { %541 = vmatpush.bf16.msra.mxu2 %v843_v21 }
  0x4d   : > { %383 = vmatpush.bf16.msra.mxu0 %v825_v10 }
  0x4e   : > { %463 = vmatpush.bf16.msra.mxu1 %v833_v11 }
  0x4f   : > { %542 = vmatpush.bf16.msra.mxu2 %v842_v22 }
  0x51   : > { %384 = vmatpush.bf16.msra.mxu0 %v824_v12 }
  0x52   : > { %464 = vmatpush.bf16.msra.mxu1 %v832_v16 }
  0x53   : > { %543 = vmatpush.bf16.msra.mxu2 %v841_v23 }
  0x55   : > { %385 = vmatpush.bf16.msra.mxu0 %v823_v13 }
  0x56   : > { %465 = vmatpush.bf16.msra.mxu1 %v831_v17 }
  0x57   : > { %544 = vmatpush.bf16.msra.mxu2 %v840_v30 }
  0x58   : > { %386 = vmatmul.bf16.vlgmr.msra.gmra.mxu0 %v312_v15 }
  0x5b   : > { %545 = vmatpush.bf16.msra.mxu2 %v839_v31 }
  0xd5   : > { %v387_v25 = vpop.f32.mrf.mxu0 }
  0xd6   : > { %v388_v26 = vadd.f32 %v936_v24, %v387_v25 }
  0xd8   : > { %v391_v27 = vmax.f32 %v388_v26, 0.0 }
  0xda   : > { %v392_v28 = vpack.c.bf16 %v391_v27, %v391_v27 }
  0xdc   : > { %466 = vmatmul.bf16.vlgmr.msra.gmra.mxu1 %v392_v28 }
  0xdd   : > { %v389_v29 = vpop.f32.mrf.mxu0 }
 0x159   : > { %v467_v33 = vpop.f32.mrf.mxu1 }
 0x15a   : > { %v468_v34 = vadd.f32 %v937_v32, %v467_v33 }
 0x15c   : > { %v471_v35 = vmax.f32 %v468_v34, 0.0 }
 0x15e   : > { %v472_v36 = vpack.c.bf16 %v471_v35, %v471_v35 }
 0x160   : > { %546 = vmatmul.bf16.vlgmr.msra.gmra.mxu2 %v472_v36 }
 0x161   : > { %v469_v37 = vpop.f32.mrf.mxu1 }
 0x1e3   : > { %v547_v39 = vpop.f32.mrf.mxu2 }
 0x1e4   : > { %v548_v40 = vadd.f32 %v938_v38, %v547_v39 }
 0x1e6   : > { %v551_v41 = vadd.f32 %v548_v40, %v306_v14 }
 0x1e8   : > { %552 = vadd.xlane.f32.xlu0 %v551_v41 }
 0x1eb   : > { %v549_v42 = vpop.f32.mrf.mxu2 }
 0x25b   : > { %v553_v45 = vpop.xlane.xlu0 %552 }
 0x25c   : > { %v554_v46 = vmul.f32 0.03125, %v553_v45 }
 0x25e   : > { %v555_v47 = vsub.f32 %v551_v41, %v554_v46 }
 0x260   : > { %v561_v48 = vsel %vm558_vm0, %v555_v47, 0.0 }
 0x261   : > { %v562_v49 = vmul.f32 %v561_v48, %v561_v48 }
 0x263   : > { %563 = vadd.xlane.f32.xlu0 %v562_v49 }
 0x2d6   : > { %v564_v50 = vpop.xlane.xlu0 %563 }
 0x2d7   : > { %v565_v51 = vmul.f32 0.03125, %v564_v50 }
 0x2d9   : > { %v566_v52 = vadd.f32 1e-05, %v565_v51 }
 0x2db   : > { %941 = vrsqrt.f32 %v566_v52  ;;  %vm573_vm2 = vweird.f32 %v566_v52 }
 0x2e1   : > { %v942_v53 = vpop.eup %941 }
 0x2e2   : > { %v568_v54 = vmul.f32 %v942_v53, %v566_v52  ;;  %vm574_vm1 = vweird.f32 %v942_v53 }
 0x2e3   : > { %vm575_vm3 = vmor %vm573_vm2, %vm574_vm1 }
 0x2e4   : > { %v569_v55 = vmul.f32 %v942_v53, %v568_v54 }
 0x2e6   : > { %v570_v56 = vmul.f32 0.5, %v569_v55 }
 0x2e8   : > { %v571_v57 = vsub.f32 1.5, %v570_v56 }
 0x2ea   : > { %v572_v58 = vmul.f32 %v942_v53, %v571_v57 }
 0x2ec   : > { %v576_v60 = vsel %vm575_vm3, %v942_v53, %v572_v58 }
 0x2ed   : > { %v577_v61 = vmul.f32 %v576_v60, %v561_v48 }
 0x2ef   : > { %v579_v63 = vmul.f32 %v939_v59, %v577_v61 }
 0x2f1   : > { %v581_v0 = vadd.f32 %v940_v62, %v579_v63 }
 0x2f3   : > { %582 = vst [vmem:[%s305_s27] sm:$0xff] %v581_v0 }
 0x2f4   : > { %1120 = shalt.err (!%p1117_p9)
}
 0x2f5   : > { %865 = dma.vmem_to_hbm [thread:$0]  (%p1292_p4), %s597_s28, 128, %s599_s6, %s584_s25  }
 0x2f6 PF: > { %s610_s10 = sand.u32 1, %s1155_s18   ;;  %p1392_p10 = scmp.ge.s32.totalorder %s1167_s21, 2 }
 0x2f7   : > { %s611_s30 = scalar_lea.sflag [#allocation4], %s610_s10 }
 0x2f8   : > { %p885_p13 = pnand %p1392_p10, %p1296_p6 }
 0x2fa   : > { %p886_p11 = pneg %p885_p13 }
 0x2fc   : > { %1150 = dma.done.wait (%p886_p11), %s611_s30, 128  }
 0x2fd   : > { %1152 = vsyncadd (%p886_p11), %s611_s30, 4294967168  ;;  %p20_p0 = scmp.ge.s32.totalorder %s1266_s29, 4   ;;  %s1393_s18 = smov %s1159_s19 }
 0x2fe   : > { %s1394_s19 = smov %s1163_s20  ;;  %s1395_s20 = smov %s1277_s8 }
 0x2ff   : > { %s1396_s21 = smov %s1266_s29  ;;  %22 = sbr.rel (!%p20_p0) target bundleno = 7 (0x7), region = 101 }
 0x304   :  { %617 = vsyncpa [#allocation3], 1 }
 0x305   :  { %619 = vsyncpa [#allocation3 + $0x1], 1 }
 0x306   :  { %620 = vsyncpa [#allocation6], 1 }
 0x307   :  { %621 = vsyncpa [#allocation9], 1 }
 0x308   :  { %622 = vsyncpa [#allocation4], 1 }
 0x309   :  { %624 = vsyncpa [#allocation4 + $0x1], 1 }

</bundles_post_ra>
